<compile_context>
chip_gen: v7x
topology: tpu7x:2x2x1
jax: 0.10.0
libtpu: 0.0.40
codegen_flags: <defaults>
</compile_context>

<pallas_src>
import functools

import jax
import jax.numpy as jnp
from jax.experimental import pallas as pl
from jax.experimental.pallas import tpu as pltpu


def _round_up(x, m):
    return (x + m - 1) // m * m


def _cdiv(a, b):
    return -(-a // b)


# --------------------------------------------------------------------------
# Kernel
# --------------------------------------------------------------------------
def _nc_kernel(xar_ref, r_ref,
               w1_ref, b1_ref, w2_ref, b2_ref,
               w3h_ref, w3xar_ref, b3_ref, w4_ref, b4_ref,
               out_ref, *, compute_dtype):
    f32 = jnp.float32
    xar = xar_ref[...]            # (bb, 3D), already in compute_dtype
    r = r_ref[...]                # (bb, D), f32 — mask math stays f32

    # encoder: relu([x|a|r] @ W1 + b1) -> latent   (single fused K=3D dot)
    h1 = jnp.dot(xar, w1_ref[...], preferred_element_type=f32) + b1_ref[...]
    h1 = jnp.maximum(h1, 0.0)
    h = (jnp.dot(h1.astype(compute_dtype), w2_ref[...],
                 preferred_element_type=f32) + b2_ref[...])          # (bb, Lp) lane-dense

    # decoder: relu([h|x|a|r] @ W3 + b3) @ W4 + b4   (2 dots instead of 4)
    h2 = (jnp.dot(h.astype(compute_dtype), w3h_ref[...], preferred_element_type=f32)
          + jnp.dot(xar, w3xar_ref[...], preferred_element_type=f32)
          + b3_ref[...])
    h2 = jnp.maximum(h2, 0.0)
    out = (jnp.dot(h2.astype(compute_dtype), w4_ref[...],
                   preferred_element_type=f32) + b4_ref[...])

    out_ref[...] = out * r        # mask by r (f32)


# --------------------------------------------------------------------------
# One-time parameter preparation (hoisted out of the per-call hot path)
# --------------------------------------------------------------------------
def prepare_params(params, compute_dtype=jnp.bfloat16):
    """Slice / pad / cast NC parameters for the Pallas kernel (do this once)."""
    cd = compute_dtype
    f32 = jnp.float32

    D3, H = params["w1"].shape
    D = D3 // 3
    L = params["w2"].shape[1]
    Lp = _round_up(L, 128)                      # lane-dense latent
    assert Lp >= L and Lp % 128 == 0
    assert params["w3"].shape[0] == L + 3 * D

    w1 = params["w1"].astype(cd)                                    # (3D, H)
    b1 = params["b1"].reshape(1, H).astype(f32)

    # zero-padded latent columns/rows => padded lanes contribute exactly 0
    w2 = jnp.zeros((H, Lp), cd).at[:, :L].set(params["w2"].astype(cd))
    b2 = jnp.zeros((1, Lp), f32).at[:, :L].set(
        params["b2"].reshape(1, L).astype(f32))

    w3 = params["w3"].astype(cd)
    w3h = jnp.zeros((Lp, H), cd).at[:L, :].set(w3[:L])              # (Lp, H)
    w3xar = w3[L:]                                                  # (3D, H)
    b3 = params["b3"].reshape(1, H).astype(f32)

    w4 = params["w4"].astype(cd)                                    # (H, D)
    b4 = params["b4"].reshape(1, D).astype(f32)

    return dict(D=D, H=H, L=L, Lp=Lp, compute_dtype=cd,
                w1=w1, b1=b1, w2=w2, b2=b2,
                w3h=w3h, w3xar=w3xar, b3=b3, w4=w4, b4=b4)


# --------------------------------------------------------------------------
# Forward wrappers
# --------------------------------------------------------------------------
def nc_forward_prepared(x_a, a, r, z, prep, *, block_b=2048):
    """NC.forward with pre-prepared params. `z` is unused (matches PyTorch)."""
    del z
    B, D = x_a.shape
    assert D == prep["D"]
    cd = prep["compute_dtype"]
    f32 = jnp.float32
    H, Lp = prep["H"], prep["Lp"]

    # wrapper-side concat: single streamed activation tensor for the MXU dots
    xar = jnp.concatenate([x_a, a, r], axis=1).astype(cd)           # (B, 3D)
    r32 = r.astype(f32)                                             # mask stays f32

    # ---- batch tiling: 8-aligned tile, even grid length (v7x megacore) ----
    B8 = _round_up(B, 8)
    bb = min(_round_up(max(block_b, 8), 8), B8)
    steps = _cdiv(B8, bb)
    if steps > 1 and steps % 2 == 1:
        steps += 1
        bb = _round_up(_cdiv(B8, steps), 8)
        steps = _cdiv(B8, bb)
        if steps % 2 == 1:          # rare rounding edge case: pad an extra tile
            steps += 1
    Bp = steps * bb
    if Bp != B:
        pad = ((0, Bp - B), (0, 0))
        xar = jnp.pad(xar, pad)
        r32 = jnp.pad(r32, pad)

    xar_spec = pl.BlockSpec((bb, 3 * D), lambda i: (i, 0))
    act_spec = pl.BlockSpec((bb, D), lambda i: (i, 0))

    def res(arr):   # constant index_map -> weight block resident across steps
        return pl.BlockSpec(arr.shape, lambda i: (0, 0))

    weights = (prep["w1"], prep["b1"], prep["w2"], prep["b2"],
               prep["w3h"], prep["w3xar"], prep["b3"], prep["w4"], prep["b4"])

    flops = 2 * Bp * (3 * D * H + H * Lp + (Lp + 3 * D) * H + H * D)
    weight_bytes = sum(int(w.size) * w.dtype.itemsize for w in weights)
    bytes_accessed = (int(xar.size) * xar.dtype.itemsize
                      + int(r32.size) * 4
                      + Bp * D * 4            # output
                      + weight_bytes)
    cost = pl.CostEstimate(flops=int(flops), transcendentals=0,
                           bytes_accessed=int(bytes_accessed))

    out = pl.pallas_call(
        functools.partial(_nc_kernel, compute_dtype=cd),
        out_shape=jax.ShapeDtypeStruct((Bp, D), jnp.float32),
        grid_spec=pltpu.PrefetchScalarGridSpec(
            num_scalar_prefetch=0,
            grid=(steps,),
            in_specs=[xar_spec, act_spec] + [res(w) for w in weights],
            out_specs=act_spec),
        compiler_params=pltpu.CompilerParams(
            dimension_semantics=("parallel",)),   # megacore sharding on v7x
        cost_estimate=cost,
    )(xar, r32, *weights)
    return out[:B]


def nc_forward(x_a, a, r, z, params, *, block_b=2048,
               compute_dtype=jnp.bfloat16):
    """Convenience wrapper: prepares params then runs the kernel."""
    prep = prepare_params(params, compute_dtype)
    return nc_forward_prepared(x_a, a, r, z, prep, block_b=block_b)


# --------------------------------------------------------------------------
# Synthetic parameters + plain-JAX reference
# --------------------------------------------------------------------------
def init_params(key, input_dim, latent_dim=64, hidden=128):
    """Deterministic synthetic parameters (nn.Linear shapes, stored as (in,out))."""
    ks = jax.random.split(key, 8)

    def lin(kw, kb, fan_in, fan_out):
        scale = 1.0 / jnp.sqrt(jnp.float32(fan_in))
        w = jax.random.uniform(kw, (fan_in, fan_out), jnp.float32, -scale, scale)
        b = jax.random.uniform(kb, (1, fan_out), jnp.float32, -scale, scale)
        return w, b

    w1, b1 = lin(ks[0], ks[1], 3 * input_dim, hidden)
    w2, b2 = lin(ks[2], ks[3], hidden, latent_dim)
    w3, b3 = lin(ks[4], ks[5], latent_dim + 3 * input_dim, hidden)
    w4, b4 = lin(ks[6], ks[7], hidden, input_dim)
    return dict(w1=w1, b1=b1, w2=w2, b2=b2, w3=w3, b3=b3, w4=w4, b4=b4)


def nc_forward_ref(x_a, a, r, z, p, compute_dtype=jnp.float32):
    """Plain-JAX reference (matmul operands cast to compute_dtype, f32 accumulate)."""
    del z

    def mm(x, w):
        return jnp.dot(x.astype(compute_dtype), w.astype(compute_dtype),
                       preferred_element_type=jnp.float32)

    enc_in = jnp.concatenate([x_a, a, r], axis=1)
    h1 = jnp.maximum(mm(enc_in, p["w1"]) + p["b1"], 0.0)
    h = mm(h1, p["w2"]) + p["b2"]
    dec_in = jnp.concatenate([h, x_a, a, r], axis=1)
    h2 = jnp.maximum(mm(dec_in, p["w3"]) + p["b3"], 0.0)
    return (mm(h2, p["w4"]) + p["b4"]) * r


# --------------------------------------------------------------------------
# Self-test
# --------------------------------------------------------------------------
if __name__ == "__main__":
    input_dim = 16
    latent_dim = 64
    B = 300   # not a multiple of 8 or of the tile -> exercises padding + even grid

    key = jax.random.PRNGKey(0)
    k_p, k_x, k_a, k_r, k_z = jax.random.split(key, 5)

    params = init_params(k_p, input_dim, latent_dim)

    x_a = jax.random.normal(k_x, (B, input_dim), jnp.float32)
    a = jax.random.normal(k_a, (B, input_dim), jnp.float32)
    # r acts as a mask in the original usage; make it {0,1}-like but keep float
    r = (jax.random.uniform(k_r, (B, input_dim)) > 0.5).astype(jnp.float32)
    z = jax.random.normal(k_z, (B, input_dim), jnp.float32)  # unused, as in PyTorch

    # --- default bf16-MXU path, small tile (4-step even grid, tests padding) ---
    prep_bf16 = prepare_params(params)                 # one-time param prep
    out_bf16 = jax.block_until_ready(
        nc_forward_prepared(x_a, a, r, z, prep_bf16, block_b=128))
    ref_bf16 = nc_forward_ref(x_a, a, r, z, params, compute_dtype=jnp.bfloat16)
    assert out_bf16.shape == (B, input_dim)
    err = float(jnp.max(jnp.abs(out_bf16 - ref_bf16)))
    assert jnp.allclose(out_bf16, ref_bf16, atol=5e-2, rtol=5e-2), err

    # --- default big tile (whole batch in one grid step) ---
    out_bf16_big = jax.block_until_ready(nc_forward(x_a, a, r, z, params))
    err = float(jnp.max(jnp.abs(out_bf16_big - ref_bf16)))
    assert jnp.allclose(out_bf16_big, ref_bf16, atol=5e-2, rtol=5e-2), err

    # --- f32-operand path (matches PyTorch numerics up to MXU f32 emulation) ---
    out_f32 = jax.block_until_ready(
        nc_forward(x_a, a, r, z, params, block_b=128, compute_dtype=jnp.float32))
    ref_f32 = nc_forward_ref(x_a, a, r, z, params, compute_dtype=jnp.float32)
    err = float(jnp.max(jnp.abs(out_f32 - ref_f32)))
    assert jnp.allclose(out_f32, ref_f32, atol=1e-2, rtol=1e-2), err

    print("KERNEL_OK")
</pallas_src>

<mosaic_0001>
module attributes {stable_mosaic.version = 11 : i64} {
  func.func @_nc_kernel(%arg0: i32, %arg1: memref<80x48xbf16, #tpu.memory_space<vmem>>, %arg2: memref<80x16xf32, #tpu.memory_space<vmem>>, %arg3: memref<48x128xbf16, #tpu.memory_space<vmem>>, %arg4: memref<1x128xf32, #tpu.memory_space<vmem>>, %arg5: memref<128x128xbf16, #tpu.memory_space<vmem>>, %arg6: memref<1x128xf32, #tpu.memory_space<vmem>>, %arg7: memref<128x128xbf16, #tpu.memory_space<vmem>>, %arg8: memref<48x128xbf16, #tpu.memory_space<vmem>>, %arg9: memref<1x128xf32, #tpu.memory_space<vmem>>, %arg10: memref<128x16xbf16, #tpu.memory_space<vmem>>, %arg11: memref<1x16xf32, #tpu.memory_space<vmem>>, %arg12: memref<80x16xf32, #tpu.memory_space<vmem>>) attributes {dimension_semantics = [#tpu.dimension_semantics<parallel>], iteration_bounds = array<i64: 4>, scalar_prefetch = 0 : i64, scratch_operands = 0 : i64, tpu.core_type = #tpu.core_type<tc>, window_params = [{transform_indices = @transform_0, window_bounds = array<i64: 80, 48>}, {transform_indices = @transform_1, window_bounds = array<i64: 80, 16>}, {pipeline_mode = #tpu.pipeline_mode<synchronous>, transform_indices = @transform_2, window_bounds = array<i64: 48, 128>}, {pipeline_mode = #tpu.pipeline_mode<synchronous>, transform_indices = @transform_3, window_bounds = array<i64: 1, 128>}, {pipeline_mode = #tpu.pipeline_mode<synchronous>, transform_indices = @transform_4, window_bounds = array<i64: 128, 128>}, {pipeline_mode = #tpu.pipeline_mode<synchronous>, transform_indices = @transform_5, window_bounds = array<i64: 1, 128>}, {pipeline_mode = #tpu.pipeline_mode<synchronous>, transform_indices = @transform_6, window_bounds = array<i64: 128, 128>}, {pipeline_mode = #tpu.pipeline_mode<synchronous>, transform_indices = @transform_7, window_bounds = array<i64: 48, 128>}, {pipeline_mode = #tpu.pipeline_mode<synchronous>, transform_indices = @transform_8, window_bounds = array<i64: 1, 128>}, {pipeline_mode = #tpu.pipeline_mode<synchronous>, transform_indices = @transform_9, window_bounds = array<i64: 128, 16>}, {pipeline_mode = #tpu.pipeline_mode<synchronous>, transform_indices = @transform_10, window_bounds = array<i64: 1, 16>}, {transform_indices = @transform_11, window_bounds = array<i64: 80, 16>}]} {
    %c0 = arith.constant 0 : index
    %c0_0 = arith.constant 0 : index
    %0 = vector.load %arg1[%c0, %c0_0] : memref<80x48xbf16, #tpu.memory_space<vmem>>, vector<80x48xbf16>
    %c0_1 = arith.constant 0 : index
    %c0_2 = arith.constant 0 : index
    %1 = vector.load %arg2[%c0_1, %c0_2] : memref<80x16xf32, #tpu.memory_space<vmem>>, vector<80x16xf32>
    %c0_3 = arith.constant 0 : index
    %c0_4 = arith.constant 0 : index
    %2 = vector.load %arg3[%c0_3, %c0_4] : memref<48x128xbf16, #tpu.memory_space<vmem>>, vector<48x128xbf16>
    %cst = arith.constant dense<0.000000e+00> : vector<80x128xf32>
    %3 = tpu.matmul %0, %2, %cst {dimension_numbers = #tpu.dot_dimension_numbers<[1], [0], [0], [1], [0, 0, 1, 1], [], []>} : vector<80x48xbf16>, vector<48x128xbf16>, vector<80x128xf32> -> vector<80x128xf32>
    %c0_5 = arith.constant 0 : index
    %c0_6 = arith.constant 0 : index
    %4 = vector.load %arg4[%c0_5, %c0_6] : memref<1x128xf32, #tpu.memory_space<vmem>>, vector<1x128xf32>
    %5 = vector.broadcast %4 : vector<1x128xf32> to vector<80x128xf32>
    %6 = arith.addf %3, %5 : vector<80x128xf32>
    %cst_7 = arith.constant 0.000000e+00 : f32
    %7 = vector.broadcast %cst_7 : f32 to vector<80x128xf32>
    %8 = arith.maximumf %6, %7 : vector<80x128xf32>
    %9 = arith.truncf %8 : vector<80x128xf32> to vector<80x128xbf16>
    %c0_8 = arith.constant 0 : index
    %c0_9 = arith.constant 0 : index
    %10 = vector.load %arg5[%c0_8, %c0_9] : memref<128x128xbf16, #tpu.memory_space<vmem>>, vector<128x128xbf16>
    %cst_10 = arith.constant dense<0.000000e+00> : vector<80x128xf32>
    %11 = tpu.matmul %9, %10, %cst_10 {dimension_numbers = #tpu.dot_dimension_numbers<[1], [0], [0], [1], [0, 0, 1, 1], [], []>} : vector<80x128xbf16>, vector<128x128xbf16>, vector<80x128xf32> -> vector<80x128xf32>
    %c0_11 = arith.constant 0 : index
    %c0_12 = arith.constant 0 : index
    %12 = vector.load %arg6[%c0_11, %c0_12] : memref<1x128xf32, #tpu.memory_space<vmem>>, vector<1x128xf32>
    %13 = vector.broadcast %12 : vector<1x128xf32> to vector<80x128xf32>
    %14 = arith.addf %11, %13 : vector<80x128xf32>
    %15 = arith.truncf %14 : vector<80x128xf32> to vector<80x128xbf16>
    %c0_13 = arith.constant 0 : index
    %c0_14 = arith.constant 0 : index
    %16 = vector.load %arg7[%c0_13, %c0_14] : memref<128x128xbf16, #tpu.memory_space<vmem>>, vector<128x128xbf16>
    %cst_15 = arith.constant dense<0.000000e+00> : vector<80x128xf32>
    %17 = tpu.matmul %15, %16, %cst_15 {dimension_numbers = #tpu.dot_dimension_numbers<[1], [0], [0], [1], [0, 0, 1, 1], [], []>} : vector<80x128xbf16>, vector<128x128xbf16>, vector<80x128xf32> -> vector<80x128xf32>
    %c0_16 = arith.constant 0 : index
    %c0_17 = arith.constant 0 : index
    %18 = vector.load %arg8[%c0_16, %c0_17] : memref<48x128xbf16, #tpu.memory_space<vmem>>, vector<48x128xbf16>
    %cst_18 = arith.constant dense<0.000000e+00> : vector<80x128xf32>
    %19 = tpu.matmul %0, %18, %cst_18 {dimension_numbers = #tpu.dot_dimension_numbers<[1], [0], [0], [1], [0, 0, 1, 1], [], []>} : vector<80x48xbf16>, vector<48x128xbf16>, vector<80x128xf32> -> vector<80x128xf32>
    %20 = arith.addf %17, %19 : vector<80x128xf32>
    %c0_19 = arith.constant 0 : index
    %c0_20 = arith.constant 0 : index
    %21 = vector.load %arg9[%c0_19, %c0_20] : memref<1x128xf32, #tpu.memory_space<vmem>>, vector<1x128xf32>
    %22 = vector.broadcast %21 : vector<1x128xf32> to vector<80x128xf32>
    %23 = arith.addf %20, %22 : vector<80x128xf32>
    %cst_21 = arith.constant 0.000000e+00 : f32
    %24 = vector.broadcast %cst_21 : f32 to vector<80x128xf32>
    %25 = arith.maximumf %23, %24 : vector<80x128xf32>
    %26 = arith.truncf %25 : vector<80x128xf32> to vector<80x128xbf16>
    %c0_22 = arith.constant 0 : index
    %c0_23 = arith.constant 0 : index
    %27 = vector.load %arg10[%c0_22, %c0_23] : memref<128x16xbf16, #tpu.memory_space<vmem>>, vector<128x16xbf16>
    %cst_24 = arith.constant dense<0.000000e+00> : vector<80x16xf32>
    %28 = tpu.matmul %26, %27, %cst_24 {dimension_numbers = #tpu.dot_dimension_numbers<[1], [0], [0], [1], [0, 0, 1, 1], [], []>} : vector<80x128xbf16>, vector<128x16xbf16>, vector<80x16xf32> -> vector<80x16xf32>
    %c0_25 = arith.constant 0 : index
    %c0_26 = arith.constant 0 : index
    %29 = vector.load %arg11[%c0_25, %c0_26] : memref<1x16xf32, #tpu.memory_space<vmem>>, vector<1x16xf32>
    %30 = vector.broadcast %29 : vector<1x16xf32> to vector<80x16xf32>
    %31 = arith.addf %28, %30 : vector<80x16xf32>
    %32 = arith.mulf %31, %1 : vector<80x16xf32>
    %c0_27 = arith.constant 0 : index
    %c0_28 = arith.constant 0 : index
    %33 = vector.load %arg12[%c0_27, %c0_28] : memref<80x16xf32, #tpu.memory_space<vmem>>, vector<80x16xf32>
    tpu.vector_store %arg12[%c0_27, %c0_28], %32 {strides = array<i32>} : memref<80x16xf32, #tpu.memory_space<vmem>>, vector<80x16xf32>,
    return
  }
  func.func @transform_0(%arg0: i32) -> (i32, i32) {
    %c0_i32 = arith.constant 0 : i32
    %c0_i32_0 = arith.constant 0 : i32
    return %arg0, %c0_i32 : i32, i32
  }
  func.func @transform_1(%arg0: i32) -> (i32, i32) {
    %c0_i32 = arith.constant 0 : i32
    %c0_i32_0 = arith.constant 0 : i32
    return %arg0, %c0_i32 : i32, i32
  }
  func.func @transform_2(%arg0: i32) -> (i32, i32) {
    %c0_i32 = arith.constant 0 : i32
    %c0_i32_0 = arith.constant 0 : i32
    %c0_i32_1 = arith.constant 0 : i32
    return %c0_i32, %c0_i32_0 : i32, i32
  }
  func.func @transform_3(%arg0: i32) -> (i32, i32) {
    %c0_i32 = arith.constant 0 : i32
    %c0_i32_0 = arith.constant 0 : i32
    %c0_i32_1 = arith.constant 0 : i32
    return %c0_i32, %c0_i32_0 : i32, i32
  }
  func.func @transform_4(%arg0: i32) -> (i32, i32) {
    %c0_i32 = arith.constant 0 : i32
    %c0_i32_0 = arith.constant 0 : i32
    %c0_i32_1 = arith.constant 0 : i32
    return %c0_i32, %c0_i32_0 : i32, i32
  }
  func.func @transform_5(%arg0: i32) -> (i32, i32) {
    %c0_i32 = arith.constant 0 : i32
    %c0_i32_0 = arith.constant 0 : i32
    %c0_i32_1 = arith.constant 0 : i32
    return %c0_i32, %c0_i32_0 : i32, i32
  }
  func.func @transform_6(%arg0: i32) -> (i32, i32) {
    %c0_i32 = arith.constant 0 : i32
    %c0_i32_0 = arith.constant 0 : i32
    %c0_i32_1 = arith.constant 0 : i32
    return %c0_i32, %c0_i32_0 : i32, i32
  }
  func.func @transform_7(%arg0: i32) -> (i32, i32) {
    %c0_i32 = arith.constant 0 : i32
    %c0_i32_0 = arith.constant 0 : i32
    %c0_i32_1 = arith.constant 0 : i32
    return %c0_i32, %c0_i32_0 : i32, i32
  }
  func.func @transform_8(%arg0: i32) -> (i32, i32) {
    %c0_i32 = arith.constant 0 : i32
    %c0_i32_0 = arith.constant 0 : i32
    %c0_i32_1 = arith.constant 0 : i32
    return %c0_i32, %c0_i32_0 : i32, i32
  }
  func.func @transform_9(%arg0: i32) -> (i32, i32) {
    %c0_i32 = arith.constant 0 : i32
    %c0_i32_0 = arith.constant 0 : i32
    %c0_i32_1 = arith.constant 0 : i32
    return %c0_i32, %c0_i32_0 : i32, i32
  }
  func.func @transform_10(%arg0: i32) -> (i32, i32) {
    %c0_i32 = arith.constant 0 : i32
    %c0_i32_0 = arith.constant 0 : i32
    %c0_i32_1 = arith.constant 0 : i32
    return %c0_i32, %c0_i32_0 : i32, i32
  }
  func.func @transform_11(%arg0: i32) -> (i32, i32) {
    %c0_i32 = arith.constant 0 : i32
    %c0_i32_0 = arith.constant 0 : i32
    return %arg0, %c0_i32 : i32, i32
  }
}

</mosaic_0001>

<bundles_post_ra>
// kernel: tpu_custom_call.1
= control target key start
LH: loop header
LB: loop body
LE: loop exit
PB: predicated region body
PF: predicated region fallthrough
CT: control target
= control target key end

     0   :  { %s1636_s17 = smov 0   ;;  %s1909_s0 = inlined_call_operand.vmem [shape: bf16[320,48], index: 0, kind: input, shape index: {}]   ;;  %s1910_s1 = inlined_call_operand.vmem [shape: f32[320,16], index: 1, kind: input, shape index: {}]   ;;  %s1911_s2 = inlined_call_operand.vmem [shape: bf16[48,128], index: 2, kind: input, shape index: {}]   ;;  %s1912_s3 = inlined_call_operand.vmem [shape: f32[1,128], index: 3, kind: input, shape index: {}]   ;;  %s1913_s4 = inlined_call_operand.vmem [shape: bf16[128,128], index: 4, kind: input, shape index: {}]   ;;  %s1914_s5 = inlined_call_operand.vmem [shape: f32[1,128], index: 5, kind: input, shape index: {}]   ;;  %s1915_s6 = inlined_call_operand.vmem [shape: bf16[128,128], index: 6, kind: input, shape index: {}]   ;;  %s1916_s7 = inlined_call_operand.vmem [shape: bf16[48,128], index: 7, kind: input, shape index: {}]   ;;  %s1917_s8 = inlined_call_operand.vmem [shape: f32[1,128], index: 8, kind: input, shape index: {}]   ;;  %s1918_s9 = inlined_call_operand.vmem [shape: bf16[128,16], index: 9, kind: input, shape index: {}]   ;;  %s1919_s10 = inlined_call_operand.vmem [shape: f32[1,16], index: 10, kind: input, shape index: {}]   ;;  %s1920_s11 = inlined_call_operand.vmem [shape: f32[320,16], index: 11, kind: output, shape index: {}]  }
   0x1 LB: > { %s1241_s18 = sadd.s32 4294967295, %s1572_s17   ;;  %p1245_p0 = scmp.ge.s32.totalorder %s1572_s17, 1  ;;  %s1572_s17 = sphi %s1636_s17, %s21_s17  }
   0x2   : > { %p349_p1 = scmp.lt.s32.totalorder %s1572_s17, 5 }
   0x4   : > { %p350_p2 = pnand %p1245_p0, %p349_p1 }
   0x5   : > { %v1531_v0 = vld [vmem:[%s1911_s2] sm:$0xff] (!%p350_p2)   ;;  %v1574_v1 = vmov (!%p350_p2), 0.0   ;;  %v1532_v2 = vld [vmem:[%s1911_s2 + $0x8] sm:$0xff] (!%p350_p2)   ;;  %vm1575_vm0 = vmmov (!%p350_p2), 0   ;;  %s394_s23 = smul.u32 (!%p350_p2), 10, %s1241_s18  ;;  %v1533_v3 = vld [vmem:[%s1911_s2 + $0x10] sm:$0xff] (!%p350_p2)  }
   0x6   : > { %353 = sbr.rel (%p350_p2) target bundleno = 929 (0x3a1), region = 64  ;;  %1355 = vmatprep.subr.bf16.mxu0 (!%p350_p2), %v1574_v1  ;;  %1515 = vmatprep.subr.bf16.mxu1 (!%p350_p2), %v1574_v1  ;;  %vm489_vm1 = vcmask (!%p350_p2), 392192   ;;  %v1539_v5 = vld [vmem:[%s1913_s4] sm:$0xff] (!%p350_p2)   ;;  %v1540_v7 = vld [vmem:[%s1913_s4 + $0x8] sm:$0xff] (!%p350_p2)   ;;  %v1541_v10 = vld [vmem:[%s1913_s4 + $0x10] sm:$0xff] (!%p350_p2)   ;;  %vm1162_vm2 = vcmask (!%p350_p2), 130048  }
   0x7   : > { %1356 = vmatpush3.bf16.msra.mxu0 (!%p350_p2), %v1531_v0  ;;  %1361 = vmatprep.mubr.msk.bf16.mxu0 (!%p350_p2), %vm1575_vm0, %v1574_v1  ;;  %p395_p3 = scmp.lt.s32.totalorder (!%p350_p2), %s394_s23, 39  ;;  %v1542_v11 = vld [vmem:[%s1913_s4 + $0x18] sm:$0xff] (!%p350_p2)   ;;  %v1543_v13 = vld [vmem:[%s1913_s4 + $0x20] sm:$0xff] (!%p350_p2)   ;;  %v1544_v14 = vld [vmem:[%s1913_s4 + $0x28] sm:$0xff] (!%p350_p2)  }
   0x8   : > { %1357 = vmatprep.subr.bf16.mxu0 (!%p350_p2), %v1574_v1  ;;  %1518 = vmatpush3.bf16.msra.mxu1 (!%p350_p2), %v1531_v0  ;;  %v1545_v15 = vld [vmem:[%s1913_s4 + $0x30] sm:$0xff] (!%p350_p2)   ;;  %v1546_v16 = vld [vmem:[%s1913_s4 + $0x38] sm:$0xff] (!%p350_p2)   ;;  %v1552_v17 = vld [vmem:[%s1916_s7] sm:$0xff] (!%p350_p2)  }
   0x9   : > { %1516 = vmatprep.subr.bf16.mxu1 (!%p350_p2), %v1574_v1  ;;  %1369 = vmatprep.mubr.msk.bf16.mxu1 (!%p350_p2), %vm1575_vm0, %v1574_v1  ;;  %v1554_v18 = vld [vmem:[%s1916_s7 + $0x8] sm:$0xff] (!%p350_p2)   ;;  %v1249_v19 = vld [vmem:[%s1912_s3] ss:$0 sm:$0xff] (!%p350_p2)  ;;  %v1549_v56 = vld [vmem:[%s1915_s6 + $0x10] sm:$0xff] (!%p350_p2)  }
   0xa   : > { %v1547_v36 = vld [vmem:[%s1915_s6] sm:$0xff] (!%p350_p2)   ;;  %v1548_v46 = vld [vmem:[%s1915_s6 + $0x8] sm:$0xff] (!%p350_p2)   ;;  %v1550_v62 = vld [vmem:[%s1915_s6 + $0x18] sm:$0xff] (!%p350_p2)  }
   0xb   : > { %1358 = vmatpush3.bf16.msra.mxu0 (!%p350_p2), %v1532_v2 }
   0xc   : > { %1359 = vmatprep.subr.bf16.mxu0 (!%p350_p2), %v1574_v1  ;;  %1519 = vmatpush3.bf16.msra.mxu1 (!%p350_p2), %v1532_v2 }
   0xd   : > { %s1922_s23 = smov (!%p395_p3, %s394_s23), 39  ;;  %1517 = vmatprep.subr.bf16.mxu1 %v1574_v1 }
   0xe   : > { %s1246_s26 = sshll.u32 %s1922_s23, 2  ;;  %s1247_s21 = sshll.u32 %s1922_s23, 3 }
   0xf   : > { %s398_s29 = scalar_lea.vmem %s1909_s0, %s1246_s26  ;;  %1360 = vmatpush3.bf16.msra.mxu0 %v1533_v3  ;;  %s1866_s25 = scalar_lea.vmem %s1910_s1, %s1247_s21 }
  0x10   : > { %v1669_v4 = vld [vmem:[%s398_s29] sm:$0xff]   ;;  %1520 = vmatpush3.bf16.msra.mxu1 %v1533_v3  ;;  %1417 = vmatprep.subr.bf16.mxu0 %v1574_v1  ;;  %v1675_v6 = vld [vmem:[%s398_s29 + $0x10] sm:$0xff]   ;;  %v1687_v8 = vld [vmem:[%s398_s29 + $0x8] sm:$0xff]   ;;  %s1875_s23 = scalar_lea.vmem %s1920_s11, %s1247_s21 }
  0x11   : > { %1381 = vmatprep.subr.bf16.mxu1 %v1574_v1  ;;  %v1691_v9 = vld [vmem:[%s398_s29 + $0x18] sm:$0xff]   ;;  %v1709_v12 = vld [vmem:[%s398_s29 + $0x20] sm:$0xff]  }
  0x12   : > { %1362 = vmatmul.mubr.msk.bf16.vlgmr.msra.gmra.mrb[0].mxu0 %vm489_vm1, %v1669_v4 }
  0x13   : > { %1365 = vmatprep.mubr.msk.bf16.mxu0 %vm1575_vm0, %v1574_v1  ;;  %1370 = vmatmul.mubr.msk.bf16.vlgmr.msra.gmra.mrb[0].mxu1 %vm489_vm1, %v1675_v6 }
  0x14   : > { %1373 = vmatprep.mubr.msk.bf16.mxu1 %vm1575_vm0, %v1574_v1  ;;  %1382 = vmatpush3.bf16.msra.mxu1 %v1539_v5 }
  0x15   : > { %1383 = vmatprep.subr.bf16.mxu1 %v1574_v1  ;;  %1418 = vmatpush3.bf16.msra.mxu0 %v1552_v17  ;;  %v1263_v17 = vld [vmem:[%s1914_s5] ss:$0 sm:$0xff] }
  0x16   : > { %1419 = vmatprep.subr.bf16.mxu0 %v1574_v1 }
  0x18   : > { %1384 = vmatpush3.bf16.msra.mxu1 %v1540_v7  ;;  %v1551_v7 = vld [vmem:[%s1915_s6 + $0x20] sm:$0xff]  }
  0x19   : > { %1385 = vmatprep.subr.bf16.mxu1 %v1574_v1  ;;  %1420 = vmatpush3.bf16.msra.mxu0 %v1554_v18 }
  0x1a   : > { %1366 = vmatmul.mubr.msk.bf16.gmra.mrb[4].mxu0 %vm489_vm1, %v1687_v8  ;;  %1421 = vmatprep.subr.bf16.mxu0 %v1574_v1 }
  0x1b   : > { %1374 = vmatmul.mubr.msk.bf16.gmra.mrb[4].mxu1 %vm489_vm1, %v1691_v9  ;;  %1423 = vmatprep.mubr.msk.bf16.mxu0 %vm1575_vm0, %v1574_v1 }
  0x1c   : > { %1377 = vmatprep.mubr.msk.bf16.mxu1 %vm1575_vm0, %v1574_v1  ;;  %1386 = vmatpush3.bf16.msra.mxu1 %v1541_v10 }
  0x1d   : > { %1387 = vmatprep.subr.bf16.mxu1 %v1574_v1 }
  0x20   : > { %1388 = vmatpush3.bf16.msra.mxu1 %v1542_v11  ;;  %v1553_v11 = vld [vmem:[%s1915_s6 + $0x28] sm:$0xff]  }
  0x21   : > { %1389 = vmatprep.subr.bf16.mxu1 %v1574_v1 }
  0x23   : > { %1378 = vmatmul.mubr.msk.bf16.gmra.mrb[8].mxu1 %vm489_vm1, %v1709_v12 }
  0x24   : > { %1390 = vmatpush3.bf16.msra.mxu1 %v1543_v13  ;;  %1397 = vmatprep.mubr.msk.bf16.mxu1 %vm1575_vm0, %v1574_v1  ;;  %v1555_v13 = vld [vmem:[%s1915_s6 + $0x30] sm:$0xff]  }
  0x25   : > { %1391 = vmatprep.subr.bf16.mxu1 %v1574_v1 }
  0x28   : > { %1392 = vmatpush3.bf16.msra.mxu1 %v1544_v14  ;;  %v1556_v14 = vld [vmem:[%s1916_s7 + $0x10] sm:$0xff]  }
  0x29   : > { %1393 = vmatprep.subr.bf16.mxu1 %v1574_v1  ;;  %1422 = vmatpush3.bf16.msra.mxu0 %v1556_v14 }
  0x2a   : > { %1479 = vmatprep.subr.bf16.mxu0 %v1574_v1 }
  0x2c   : > { %1394 = vmatpush3.bf16.msra.mxu1 %v1545_v15  ;;  %v1557_v15 = vld [vmem:[%s1915_s6 + $0x38] sm:$0xff]   ;;  %1424 = vmatmul.mubr.msk.bf16.vlgmr.msra.gmra.mrb[8].mxu0 %vm489_vm1, %v1669_v4  ;;  %v1558_v4 = vld [vmem:[%s1918_s9] sm:$0xff]  }
  0x2d   : > { %1395 = vmatprep.subr.bf16.mxu1 %v1574_v1  ;;  %1427 = vmatprep.mubr.msk.bf16.mxu0 %vm1575_vm0, %v1574_v1 }
  0x2e   : > { %1480 = vmatpush3.bf16.msra.mxu0 %v1558_v4 }
  0x2f   : > { %1481 = vmatprep.subr.bf16.mxu0 %v1574_v1 }
  0x30   : > { %1396 = vmatpush3.bf16.msra.mxu1 %v1546_v16  ;;  %v1563_v16 = vld [vmem:[%s1918_s9 + $0x28] sm:$0xff]  }
  0x31   : > { %1443 = vmatprep.subr.bf16.mxu1 %v1574_v1 }
  0x34   : > { %1428 = vmatmul.mubr.msk.bf16.gmra.mrb[12].mxu0 %vm489_vm1, %v1687_v8  ;;  %v1560_v8 = vld [vmem:[%s1918_s9 + $0x10] sm:$0xff]  }
  0x35   : > { %1431 = vmatprep.mubr.msk.bf16.mxu0 %vm1575_vm0, %v1574_v1 }
  0x3c   : > { %1432 = vmatmul.mubr.msk.bf16.gmra.mrb[16].mxu0 %vm489_vm1, %v1675_v6  ;;  %v1559_v6 = vld [vmem:[%s1918_s9 + $0x8] sm:$0xff]  }
  0x3d   : > { %1435 = vmatprep.mubr.msk.bf16.mxu0 %vm1575_vm0, %v1574_v1  ;;  %1482 = vmatpush3.bf16.msra.mxu0 %v1559_v6 }
  0x3e   : > { %1483 = vmatprep.subr.bf16.mxu0 %v1574_v1 }
  0x41   : > { %1484 = vmatpush3.bf16.msra.mxu0 %v1560_v8  ;;  %v1288_v8 = vld [vmem:[%s1917_s8] ss:$0 sm:$0xff] }
  0x42   : > { %1485 = vmatprep.subr.bf16.mxu0 %v1574_v1 }
  0x44   : > { %1436 = vmatmul.mubr.msk.bf16.gmra.mrb[20].mxu0 %vm489_vm1, %v1691_v9  ;;  %v1561_v9 = vld [vmem:[%s1918_s9 + $0x18] sm:$0xff]  }
  0x45   : > { %1439 = vmatprep.mubr.msk.bf16.mxu0 %vm1575_vm0, %v1574_v1  ;;  %1486 = vmatpush3.bf16.msra.mxu0 %v1561_v9 }
  0x46   : > { %1487 = vmatprep.subr.bf16.mxu0 %v1574_v1 }
  0x4c   : > { %1440 = vmatmul.mubr.msk.bf16.gmra.mrb[24].mxu0 %vm489_vm1, %v1709_v12  ;;  %v1562_v12 = vld [vmem:[%s1918_s9 + $0x20] sm:$0xff]  }
  0x4d   : > { %1495 = vmatprep.mubr.msk.bf16.mxu0 %vm1575_vm0, %v1574_v1  ;;  %1488 = vmatpush3.bf16.msra.mxu0 %v1562_v12 }
  0x4e   : > { %1489 = vmatprep.subr.bf16.mxu0 %v1574_v1 }
  0x51   : > { %1490 = vmatpush3.bf16.msra.mxu0 %v1563_v16 }
  0x52   : > { %1491 = vmatprep.subr.bf16.mxu0 %v1574_v1 }
  0xe5   : > { %v539_v20 = vpop.f32.mrb[0].mxu0 }
  0xe6   : > { %v540_v21 = vadd.f32 %v1249_v19, %v539_v20  ;;  %v1363_v22 = vpop.f32.mrb[1].mxu0  ;;  %v555_v23 = vpop.f32.mrb[0].mxu1 }
  0xe7   : > { %v542_v24 = vpop.f32.mrb[2].mxu0  ;;  %v556_v25 = vadd.f32 %v1249_v19, %v555_v23  ;;  %v1371_v26 = vpop.f32.mrb[1].mxu1 }
  0xe8   : > { %v543_v27 = vadd.f32 %v1249_v19, %v542_v24  ;;  %v1364_v28 = vpop.f32.mrb[3].mxu0  ;;  %v558_v29 = vpop.f32.mrb[2].mxu1  ;;  %v578_v33 = vmax.f32 %v540_v21, 0.0 }
  0xe9   : > { %v582_v30 = vmax.f32 %v556_v25, 0.0  ;;  %v559_v31 = vadd.f32 %v1249_v19, %v558_v29  ;;  %v1372_v32 = vpop.f32.mrb[3].mxu1 }
  0xea   : > { %v579_v34 = vmax.f32 %v543_v27, 0.0 }
  0xeb   : > { %v583_v35 = vmax.f32 %v559_v31, 0.0 }
  0xec   : > { %v588_v37 = vpack.c.bf16 %v579_v34, %v578_v33 }
  0xed   : > { %v547_v38 = vpop.f32.mrb[4].mxu0  ;;  %v590_v39 = vpack.c.bf16 %v583_v35, %v582_v30 }
  0xee   : > { %v548_v40 = vadd.f32 %v1249_v19, %v547_v38  ;;  %v1367_v41 = vpop.f32.mrb[5].mxu0  ;;  %1398 = vmatmul.mubr.bf16.vlgmr.msra.gmra.mrb[12].mxu1 %v588_v37  ;;  %v563_v42 = vpop.f32.mrb[4].mxu1 }
  0xef   : > { %v550_v43 = vpop.f32.mrb[6].mxu0  ;;  %1401 = vmatprep.mubr.msk.bf16.mxu1 %vm1575_vm0, %v1574_v1  ;;  %v564_v44 = vadd.f32 %v1249_v19, %v563_v42  ;;  %v1375_v45 = vpop.f32.mrb[5].mxu1  ;;  %1444 = vmatpush3.bf16.msra.mxu1 %v1547_v36 }
  0xf0   : > { %v551_v47 = vadd.f32 %v1249_v19, %v550_v43  ;;  %v1368_v48 = vpop.f32.mrb[7].mxu0  ;;  %v566_v49 = vpop.f32.mrb[6].mxu1  ;;  %1445 = vmatprep.subr.bf16.mxu1 %v1574_v1  ;;  %v580_v53 = vmax.f32 %v548_v40, 0.0 }
  0xf1   : > { %v584_v50 = vmax.f32 %v564_v44, 0.0  ;;  %v567_v51 = vadd.f32 %v1249_v19, %v566_v49  ;;  %v1376_v52 = vpop.f32.mrb[7].mxu1 }
  0xf2   : > { %v581_v54 = vmax.f32 %v551_v47, 0.0 }
  0xf3   : > { %v585_v55 = vmax.f32 %v567_v51, 0.0  ;;  %1446 = vmatpush3.bf16.msra.mxu1 %v1548_v46 }
  0xf4   : > { %v589_v57 = vpack.c.bf16 %v581_v54, %v580_v53  ;;  %1447 = vmatprep.subr.bf16.mxu1 %v1574_v1 }
  0xf5   : > { %v591_v58 = vpack.c.bf16 %v585_v55, %v584_v50 }
  0xf6   : > { %1402 = vmatmul.mubr.bf16.gmra.mrb[16].mxu1 %v589_v57  ;;  %v571_v59 = vpop.f32.mrb[8].mxu1  ;;  %v1564_v57 = vld [vmem:[%s1918_s9 + $0x30] sm:$0xff]  }
  0xf7   : > { %1405 = vmatprep.mubr.msk.bf16.mxu1 %vm1575_vm0, %v1574_v1  ;;  %v572_v60 = vadd.f32 %v1249_v19, %v571_v59  ;;  %v1379_v61 = vpop.f32.mrb[9].mxu1  ;;  %1448 = vmatpush3.bf16.msra.mxu1 %v1549_v56 }
  0xf8   : > { %v574_v63 = vpop.f32.mrb[10].mxu1  ;;  %1449 = vmatprep.subr.bf16.mxu1 %v1574_v1  ;;  %1492 = vmatpush3.bf16.msra.mxu0 %v1564_v57 }
  0xf9   : > { %v586_v0 = vmax.f32 %v572_v60, 0.0  ;;  %v575_v2 = vadd.f32 %v1249_v19, %v574_v63  ;;  %v1380_v3 = vpop.f32.mrb[11].mxu1  ;;  %1493 = vmatprep.subr.bf16.mxu0 %v1574_v1  ;;  %v1565_v60 = vld [vmem:[%s1918_s9 + $0x38] sm:$0xff]  }
  0xfb   : > { %v587_v5 = vmax.f32 %v575_v2, 0.0  ;;  %1450 = vmatpush3.bf16.msra.mxu1 %v1550_v62 }
  0xfc   : > { %1451 = vmatprep.subr.bf16.mxu1 %v1574_v1  ;;  %1494 = vmatpush3.bf16.msra.mxu0 %v1565_v60 }
  0xfd   : > { %v592_v10 = vpack.c.bf16 %v587_v5, %v586_v0 }
  0xfe   : > { %1406 = vmatmul.mubr.bf16.gmra.mrb[20].mxu1 %v590_v39 }
  0xff   : > { %1409 = vmatprep.mubr.msk.bf16.mxu1 %vm1575_vm0, %v1574_v1  ;;  %1452 = vmatpush3.bf16.msra.mxu1 %v1551_v7  ;;  %v816_v53 = vpop.f32.mrb[8].mxu0 }
 0x100   : > { %1453 = vmatprep.subr.bf16.mxu1 %v1574_v1  ;;  %v1425_v54 = vpop.f32.mrb[9].mxu0 }
 0x101   : > { %v819_v55 = vpop.f32.mrb[10].mxu0 }
 0x102   : > { %v1426_v56 = vpop.f32.mrb[11].mxu0 }
 0x103   : > { %1454 = vmatpush3.bf16.msra.mxu1 %v1553_v11 }
 0x104   : > { %1455 = vmatprep.subr.bf16.mxu1 %v1574_v1 }
 0x106   : > { %1410 = vmatmul.mubr.bf16.gmra.mrb[24].mxu1 %v591_v58 }
 0x107   : > { %1413 = vmatprep.mubr.msk.bf16.mxu1 %vm1575_vm0, %v1574_v1  ;;  %1456 = vmatpush3.bf16.msra.mxu1 %v1555_v13  ;;  %v824_v58 = vpop.f32.mrb[12].mxu0 }
 0x108   : > { %1457 = vmatprep.subr.bf16.mxu1 %v1574_v1  ;;  %v1429_v59 = vpop.f32.mrb[13].mxu0 }
 0x109   : > { %v827_v61 = vpop.f32.mrb[14].mxu0 }
 0x10a   : > { %v1430_v62 = vpop.f32.mrb[15].mxu0 }
 0x10b   : > { %1458 = vmatpush3.bf16.msra.mxu1 %v1557_v15 }
 0x10e   : > { %1414 = vmatmul.mubr.bf16.gmra.mrb[28].mxu1 %v592_v10 }
 0x10f   : > { %1459 = vmatprep.mubr.msk.bf16.mxu1 %vm1575_vm0, %v1574_v1  ;;  %v832_v63 = vpop.f32.mrb[16].mxu0 }
 0x110   : > { %v1433_v0 = vpop.f32.mrb[17].mxu0 }
 0x111   : > { %v835_v2 = vpop.f32.mrb[18].mxu0 }
 0x112   : > { %v1434_v3 = vpop.f32.mrb[19].mxu0 }
 0x117   : > { %v840_v5 = vpop.f32.mrb[20].mxu0 }
 0x118   : > { %v1437_v7 = vpop.f32.mrb[21].mxu0 }
 0x119   : > { %v843_v10 = vpop.f32.mrb[22].mxu0  ;;  %v1289_v7 = vld [vmem:[%s1919_s10] ss:$0 sm:$0xff] }
 0x11a   : > { %v1438_v11 = vpop.f32.mrb[23].mxu0 }
 0x11f   : > { %v848_v13 = vpop.f32.mrb[24].mxu0 }
 0x120   : > { %v1441_v14 = vpop.f32.mrb[25].mxu0 }
 0x121   : > { %v851_v15 = vpop.f32.mrb[26].mxu0  ;;  %v424_v14 = vld [vmem:[%s1866_s25 + $0x8] sm:$0xff] }
 0x122   : > { %v1442_v4 = vpop.f32.mrb[27].mxu0 }
 0x1c1   : > { %v698_v18 = vpop.f32.mrb[12].mxu1 }
 0x1c2   : > { %v1399_v19 = vpop.f32.mrb[13].mxu1  ;;  %v699_v21 = vadd.f32 %v1263_v17, %v698_v18 }
 0x1c3   : > { %v701_v20 = vpop.f32.mrb[14].mxu1 }
 0x1c4   : > { %v702_v22 = vadd.f32 %v1263_v17, %v701_v20  ;;  %v1400_v23 = vpop.f32.mrb[15].mxu1 }
 0x1c6   : > { %v737_v24 = vpack.c.bf16 %v702_v22, %v699_v21 }
 0x1c8   : > { %1460 = vmatmul.mubr.bf16.vlgmr.msra.gmra.mrb[32].mxu1 %v737_v24 }
 0x1c9   : > { %v706_v25 = vpop.f32.mrb[16].mxu1  ;;  %1463 = vmatprep.mubr.msk.bf16.mxu1 %vm1575_vm0, %v1574_v1 }
 0x1ca   : > { %v1403_v26 = vpop.f32.mrb[17].mxu1  ;;  %v707_v28 = vadd.f32 %v1263_v17, %v706_v25 }
 0x1cb   : > { %v709_v27 = vpop.f32.mrb[18].mxu1 }
 0x1cc   : > { %v710_v29 = vadd.f32 %v1263_v17, %v709_v27  ;;  %v1404_v30 = vpop.f32.mrb[19].mxu1 }
 0x1ce   : > { %v738_v31 = vpack.c.bf16 %v710_v29, %v707_v28 }
 0x1d0   : > { %1464 = vmatmul.mubr.bf16.gmra.mrb[36].mxu1 %v738_v31 }
 0x1d1   : > { %v714_v32 = vpop.f32.mrb[20].mxu1  ;;  %1467 = vmatprep.mubr.msk.bf16.mxu1 %vm1575_vm0, %v1574_v1 }
 0x1d2   : > { %v1407_v33 = vpop.f32.mrb[21].mxu1  ;;  %v715_v35 = vadd.f32 %v1263_v17, %v714_v32 }
 0x1d3   : > { %v717_v34 = vpop.f32.mrb[22].mxu1 }
 0x1d4   : > { %v718_v36 = vadd.f32 %v1263_v17, %v717_v34  ;;  %v1408_v37 = vpop.f32.mrb[23].mxu1 }
 0x1d6   : > { %v739_v38 = vpack.c.bf16 %v718_v36, %v715_v35 }
 0x1d8   : > { %1468 = vmatmul.mubr.bf16.gmra.mrb[40].mxu1 %v739_v38 }
 0x1d9   : > { %v722_v39 = vpop.f32.mrb[24].mxu1  ;;  %1471 = vmatprep.mubr.msk.bf16.mxu1 %vm1575_vm0, %v1574_v1 }
 0x1da   : > { %v1411_v40 = vpop.f32.mrb[25].mxu1  ;;  %v723_v42 = vadd.f32 %v1263_v17, %v722_v39 }
 0x1db   : > { %v725_v41 = vpop.f32.mrb[26].mxu1 }
 0x1dc   : > { %v726_v43 = vadd.f32 %v1263_v17, %v725_v41  ;;  %v1412_v44 = vpop.f32.mrb[27].mxu1 }
 0x1de   : > { %v740_v45 = vpack.c.bf16 %v726_v43, %v723_v42 }
 0x1e0   : > { %1472 = vmatmul.mubr.bf16.gmra.mrb[44].mxu1 %v740_v45 }
 0x1e1   : > { %v730_v46 = vpop.f32.mrb[28].mxu1  ;;  %1475 = vmatprep.mubr.msk.bf16.mxu1 %vm1575_vm0, %v1574_v1 }
 0x1e2   : > { %v1415_v47 = vpop.f32.mrb[29].mxu1  ;;  %v731_v49 = vadd.f32 %v1263_v17, %v730_v46 }
 0x1e3   : > { %v733_v48 = vpop.f32.mrb[30].mxu1 }
 0x1e4   : > { %v734_v50 = vadd.f32 %v1263_v17, %v733_v48  ;;  %v1416_v51 = vpop.f32.mrb[31].mxu1 }
 0x1e6   : > { %v741_v52 = vpack.c.bf16 %v734_v50, %v731_v49 }
 0x1e8   : > { %1476 = vmatmul.mubr.bf16.gmra.mrb[48].mxu1 %v741_v52 }
 0x29b   : > { %v937_v6 = vpop.f32.mrb[32].mxu1 }
 0x29c   : > { %v938_v9 = vadd.f32 %v937_v6, %v816_v53  ;;  %v1461_v12 = vpop.f32.mrb[33].mxu1 }
 0x29d   : > { %v940_v16 = vpop.f32.mrb[34].mxu1  ;;  %v425_v12 = vld [vmem:[%s1866_s25 + $0x10] sm:$0xff] }
 0x29e   : > { %v983_v17 = vadd.f32 %v1288_v8, %v938_v9  ;;  %v941_v18 = vadd.f32 %v940_v16, %v819_v55  ;;  %v1462_v19 = vpop.f32.mrb[35].mxu1 }
 0x29f   : > { %v426_v19 = vld [vmem:[%s1866_s25 + $0x18] sm:$0xff] }
 0x2a0   : > { %v984_v20 = vadd.f32 %v1288_v8, %v941_v18  ;;  %v993_v21 = vmax.f32 %v983_v17, 0.0 }
 0x2a2   : > { %v994_v22 = vmax.f32 %v984_v20, 0.0 }
 0x2a3   : > { %v945_v23 = vpop.f32.mrb[36].mxu1 }
 0x2a4   : > { %v1003_v24 = vpack.c.bf16 %v994_v22, %v993_v21  ;;  %v946_v25 = vadd.f32 %v945_v23, %v824_v58  ;;  %v1465_v26 = vpop.f32.mrb[37].mxu1 }
 0x2a5   : > { %v948_v27 = vpop.f32.mrb[38].mxu1 }
 0x2a6   : > { %v985_v28 = vadd.f32 %v1288_v8, %v946_v25  ;;  %v949_v29 = vadd.f32 %v948_v27, %v827_v61  ;;  %v1466_v30 = vpop.f32.mrb[39].mxu1  ;;  %1496 = vmatmul.mubr.bf16.vlgmr.msra.gmra.mrb[28].mxu0 %v1003_v24  ;;  %v427_v25 = vld [vmem:[%s1866_s25 + $0x20] sm:$0xff] }
 0x2a7   : > { %1499 = vmatprep.mubr.msk.bf16.mxu0 %vm1575_vm0, %v1574_v1 }
 0x2a8   : > { %v986_v31 = vadd.f32 %v1288_v8, %v949_v29  ;;  %v995_v32 = vmax.f32 %v985_v28, 0.0  ;;  %v428_v29 = vld [vmem:[%s1866_s25 + $0x28] sm:$0xff] }
 0x2aa   : > { %v996_v33 = vmax.f32 %v986_v31, 0.0 }
 0x2ab   : > { %v953_v34 = vpop.f32.mrb[40].mxu1 }
 0x2ac   : > { %v954_v35 = vadd.f32 %v953_v34, %v832_v63  ;;  %v1469_v36 = vpop.f32.mrb[41].mxu1  ;;  %v1004_v37 = vpack.c.bf16 %v996_v33, %v995_v32 }
 0x2ad   : > { %v956_v38 = vpop.f32.mrb[42].mxu1 }
 0x2ae   : > { %v987_v39 = vadd.f32 %v1288_v8, %v954_v35  ;;  %v957_v40 = vadd.f32 %v956_v38, %v835_v2  ;;  %v1470_v41 = vpop.f32.mrb[43].mxu1  ;;  %1500 = vmatmul.mubr.bf16.gmra.mrb[32].mxu0 %v1004_v37  ;;  %v429_v35 = vld [vmem:[%s1866_s25 + $0x30] sm:$0xff] }
 0x2af   : > { %1503 = vmatprep.mubr.msk.bf16.mxu0 %vm1575_vm0, %v1574_v1 }
 0x2b0   : > { %v988_v42 = vadd.f32 %v1288_v8, %v957_v40  ;;  %v997_v43 = vmax.f32 %v987_v39, 0.0  ;;  %v430_v39 = vld [vmem:[%s1866_s25 + $0x38] sm:$0xff] }
 0x2b2   : > { %v998_v44 = vmax.f32 %v988_v42, 0.0 }
 0x2b3   : > { %v961_v45 = vpop.f32.mrb[44].mxu1 }
 0x2b4   : > { %v962_v46 = vadd.f32 %v961_v45, %v840_v5  ;;  %v1473_v47 = vpop.f32.mrb[45].mxu1  ;;  %v1005_v48 = vpack.c.bf16 %v998_v44, %v997_v43  ;;  %v431_v45 = vld [vmem:[%s1866_s25 + $0x40] sm:$0xff] }
 0x2b5   : > { %v964_v49 = vpop.f32.mrb[46].mxu1 }
 0x2b6   : > { %v989_v50 = vadd.f32 %v1288_v8, %v962_v46  ;;  %v965_v51 = vadd.f32 %v964_v49, %v843_v10  ;;  %v1474_v52 = vpop.f32.mrb[47].mxu1  ;;  %1504 = vmatmul.mubr.bf16.gmra.mrb[36].mxu0 %v1005_v48  ;;  %v423_v10 = vld [vmem:[%s1866_s25] sm:$0xff]  ;;  %v432_v49 = vld [vmem:[%s1866_s25 + $0x48] sm:$0xff] }
 0x2b7   : > { %1507 = vmatprep.mubr.msk.bf16.mxu0 %vm1575_vm0, %v1574_v1 }
 0x2b8   : > { %v990_v53 = vadd.f32 %v1288_v8, %v965_v51  ;;  %v999_v54 = vmax.f32 %v989_v50, 0.0 }
 0x2ba   : > { %v1000_v55 = vmax.f32 %v990_v53, 0.0 }
 0x2bb   : > { %v969_v56 = vpop.f32.mrb[48].mxu1 }
 0x2bc   : > { %v970_v57 = vadd.f32 %v969_v56, %v848_v13  ;;  %v1477_v58 = vpop.f32.mrb[49].mxu1  ;;  %v1006_v59 = vpack.c.bf16 %v1000_v55, %v999_v54 }
 0x2bd   : > { %v972_v60 = vpop.f32.mrb[50].mxu1 }
 0x2be   : > { %v991_v61 = vadd.f32 %v1288_v8, %v970_v57  ;;  %v973_v62 = vadd.f32 %v972_v60, %v851_v15  ;;  %v1478_v63 = vpop.f32.mrb[51].mxu1  ;;  %1508 = vmatmul.mubr.bf16.gmra.mrb[40].mxu0 %v1006_v59 }
 0x2bf   : > { %1511 = vmatprep.mubr.msk.bf16.mxu0 %vm1575_vm0, %v1574_v1 }
 0x2c0   : > { %v992_v0 = vadd.f32 %v1288_v8, %v973_v62  ;;  %v1001_v2 = vmax.f32 %v991_v61, 0.0 }
 0x2c2   : > { %v1002_v3 = vmax.f32 %v992_v0, 0.0 }
 0x2c4   : > { %v1007_v5 = vpack.c.bf16 %v1002_v3, %v1001_v2 }
 0x2c6   : > { %1512 = vmatmul.mubr.bf16.gmra.mrb[44].mxu0 %v1007_v5 }
 0x379   : > { %v1113_v1 = vpop.f32.mrb[28].mxu0 }
 0x37a   : > { %v1114_v11 = vadd.f32 %v1289_v7, %v1113_v1  ;;  %v1497_v13 = vpop.f32.mrb[29].mxu0 }
 0x37b   : > { %v1116_v15 = vpop.f32.mrb[30].mxu0 }
 0x37c   : > { %v1152_v4 = vmul.f32 %v1114_v11, %v423_v10  ;;  %v1117_v6 = vadd.f32 %v1289_v7, %v1116_v15  ;;  %v1498_v8 = vpop.f32.mrb[31].mxu0 }
 0x37e   : > { %1163 = vst.msk [vmem:[%s1875_s23] sm:$0xff] %vm1162_vm2, %v1152_v4  ;;  %v1153_v9 = vmul.f32 %v1117_v6, %v424_v14 }
 0x380   : > { %1164 = vst.msk [vmem:[%s1875_s23 + $0x8] sm:$0xff] %vm1162_vm2, %v1153_v9 }
 0x381   : > { %v1121_v16 = vpop.f32.mrb[32].mxu0 }
 0x382   : > { %v1122_v17 = vadd.f32 %v1289_v7, %v1121_v16  ;;  %v1501_v18 = vpop.f32.mrb[33].mxu0 }
 0x383   : > { %v1124_v20 = vpop.f32.mrb[34].mxu0 }
 0x384   : > { %v1154_v21 = vmul.f32 %v1122_v17, %v425_v12  ;;  %v1125_v22 = vadd.f32 %v1289_v7, %v1124_v20  ;;  %v1502_v23 = vpop.f32.mrb[35].mxu0 }
 0x386   : > { %1165 = vst.msk [vmem:[%s1875_s23 + $0x10] sm:$0xff] %vm1162_vm2, %v1154_v21  ;;  %v1155_v24 = vmul.f32 %v1125_v22, %v426_v19 }
 0x388   : > { %1166 = vst.msk [vmem:[%s1875_s23 + $0x18] sm:$0xff] %vm1162_vm2, %v1155_v24 }
 0x389   : > { %v1129_v26 = vpop.f32.mrb[36].mxu0 }
 0x38a   : > { %v1130_v27 = vadd.f32 %v1289_v7, %v1129_v26  ;;  %v1505_v28 = vpop.f32.mrb[37].mxu0 }
 0x38b   : > { %v1132_v30 = vpop.f32.mrb[38].mxu0 }
 0x38c   : > { %v1156_v31 = vmul.f32 %v1130_v27, %v427_v25  ;;  %v1133_v32 = vadd.f32 %v1289_v7, %v1132_v30  ;;  %v1506_v33 = vpop.f32.mrb[39].mxu0 }
 0x38e   : > { %1167 = vst.msk [vmem:[%s1875_s23 + $0x20] sm:$0xff] %vm1162_vm2, %v1156_v31  ;;  %v1157_v34 = vmul.f32 %v1133_v32, %v428_v29 }
 0x390   : > { %1168 = vst.msk [vmem:[%s1875_s23 + $0x28] sm:$0xff] %vm1162_vm2, %v1157_v34 }
 0x391   : > { %v1137_v36 = vpop.f32.mrb[40].mxu0 }
 0x392   : > { %v1138_v37 = vadd.f32 %v1289_v7, %v1137_v36  ;;  %v1509_v38 = vpop.f32.mrb[41].mxu0 }
 0x393   : > { %v1140_v40 = vpop.f32.mrb[42].mxu0 }
 0x394   : > { %v1158_v41 = vmul.f32 %v1138_v37, %v429_v35  ;;  %v1141_v42 = vadd.f32 %v1289_v7, %v1140_v40  ;;  %v1510_v43 = vpop.f32.mrb[43].mxu0 }
 0x396   : > { %1169 = vst.msk [vmem:[%s1875_s23 + $0x30] sm:$0xff] %vm1162_vm2, %v1158_v41  ;;  %v1159_v44 = vmul.f32 %v1141_v42, %v430_v39 }
 0x398   : > { %1170 = vst.msk [vmem:[%s1875_s23 + $0x38] sm:$0xff] %vm1162_vm2, %v1159_v44 }
 0x399   : > { %v1145_v46 = vpop.f32.mrb[44].mxu0 }
 0x39a   : > { %v1146_v47 = vadd.f32 %v1289_v7, %v1145_v46  ;;  %v1513_v48 = vpop.f32.mrb[45].mxu0 }
 0x39b   : > { %v1148_v50 = vpop.f32.mrb[46].mxu0 }
 0x39c   : > { %v1160_v51 = vmul.f32 %v1146_v47, %v431_v45  ;;  %v1149_v52 = vadd.f32 %v1289_v7, %v1148_v50  ;;  %v1514_v53 = vpop.f32.mrb[47].mxu0 }
 0x39e   : > { %1171 = vst.msk [vmem:[%s1875_s23 + $0x40] sm:$0xff] %vm1162_vm2, %v1160_v51  ;;  %v1161_v54 = vmul.f32 %v1149_v52, %v432_v49 }
 0x3a0   : > { %1172 = vst.msk [vmem:[%s1875_s23 + $0x48] sm:$0xff] %vm1162_vm2, %v1161_v54 }
 0x3a1 PF: > { %s21_s17 = sadd.s32 1, %s1572_s17  }
 0x3a2   : > { %p18_p4 = scmp.ge.s32.totalorder %s21_s17, 6  }
 0x3a4   :  { %20 = sbr.rel (!%p18_p4) target bundleno = 1 (0x1), region = 97 }

</bundles_post_ra>
